<compile_context>
chip_gen: v5e
topology: v5e:2x2
jax: 0.10.0
libtpu: 0.0.40
codegen_flags: <defaults>
</compile_context>

<pallas_src>
import functools

import jax
import jax.numpy as jnp
from jax.experimental import pallas as pl
from jax.experimental.pallas import tpu as pltpu


def _echo_kernel(zp_ref, w_ref, b_ref, o_ref, *, K, WP, NOUT):
    """One grid step = one batch element. Fully fused conv-sum-ReLU.

    zp_ref : (1, CTOT, LIN)     bf16 channel-concat, spatially padded, flattened
    w_ref  : (K*K, CH, CTOT)    bf16 per-tap weights (already transposed)
    b_ref  : (CH, 1)            f32 summed bias
    o_ref  : (1, CH, NOUT)      f32 lane-dense output slab (NOUT = H * WP)
    """
    z = zp_ref[0]                                    # (CTOT, LIN) bf16, resident in VMEM
    acc = None
    for ky in range(K):
        for kx in range(K):
            t = ky * K + kx
            s = ky * WP + kx                         # tap shift in flattened padded coords
            wt = w_ref[t]                            # (CH, CTOT) bf16
            zt = z[:, s:s + NOUT]                    # (CTOT, NOUT) static lane-offset slice
            d = jnp.dot(wt, zt, preferred_element_type=jnp.float32)  # (CH, NOUT) f32
            acc = d if acc is None else acc + d
    acc = acc + b_ref[...]                           # (CH, 1) broadcast over lanes
    o_ref[0] = jnp.maximum(acc, 0.0)                 # ReLU in f32 (safe on v5e too)


def echo_cell_pallas(x, iteration, hidden, params, *, kernel_size):
    """NCHW inputs: x (B,Cin,H,W); iteration/hidden (B,CH,H,W). OIHW weights.

    Returns the new hidden state, NCHW (B, CH, H, W), float32.
    """
    B, CIN, H, W = x.shape
    CH = hidden.shape[1]
    K = kernel_size
    pad = K // 2
    CTOT = CIN + 2 * CH
    HP, WP = H + 2 * pad, W + 2 * pad
    NOUT = H * WP                                  # output columns per batch (padded width)
    SMAX = (K - 1) * WP + (K - 1)                  # largest tap shift
    LIN = ((NOUT + SMAX + 127) // 128) * 128       # flattened/zero-padded input lane width

    # --- single fused, padded, channels-first input tensor (layout glue only) ---
    z = jnp.concatenate([x, iteration, hidden], axis=1)            # (B, CTOT, H, W)
    zp = jnp.pad(z, ((0, 0), (0, 0), (pad, pad), (pad, pad)))      # (B, CTOT, HP, WP)
    zp = zp.reshape(B, CTOT, HP * WP)
    zp = jnp.pad(zp, ((0, 0), (0, 0), (0, LIN - HP * WP)))
    zp = zp.astype(jnp.bfloat16)

    # --- per-tap (CH, CTOT) weights; channel order matches the concat above ---
    w_cat = jnp.concatenate(
        [params["w_i2h"], params["w_ih2ih"], params["w_h2h"]], axis=1)   # (CH, CTOT, K, K)
    w_taps = jnp.transpose(w_cat, (2, 3, 0, 1)).reshape(K * K, CH, CTOT)
    w_taps = w_taps.astype(jnp.bfloat16)
    b_sum = (params["b_i2h"] + params["b_ih2ih"] + params["b_h2h"])
    b_sum = b_sum.reshape(CH, 1).astype(jnp.float32)

    # TODO(synk): for large H/W, tile output rows with a (K-1)-row halo on the
    # input (re-derive the budget for v7x's 64 MiB VMEM) and give each v7x core
    # >1 grid step; at these shapes the whole per-batch block is a few KB.
    # TODO(synk): when the cell is iterated, alias the hidden output onto its
    # input (input_output_aliases) and keep w_taps / b_sum resident across steps.

    kern = functools.partial(_echo_kernel, K=K, WP=WP, NOUT=NOUT)

    out = pl.pallas_call(
        kern,
        out_shape=jax.ShapeDtypeStruct((B, CH, NOUT), jnp.float32),
        grid=(B,),
        in_specs=[
            pl.BlockSpec((1, CTOT, LIN), lambda b: (b, 0, 0)),
            pl.BlockSpec((K * K, CH, CTOT), lambda b: (0, 0, 0)),
            pl.BlockSpec((CH, 1), lambda b: (0, 0)),
        ],
        out_specs=pl.BlockSpec((1, CH, NOUT), lambda b: (b, 0, 0)),
        compiler_params=pltpu.CompilerParams(
            dimension_semantics=("parallel",),
            vmem_limit_bytes=32 * 1024 * 1024),
    )(zp, w_taps, b_sum)

    # Drop the padded-width garbage columns; result is already NCHW.
    return out.reshape(B, CH, H, WP)[:, :, :, :W]


def echo_cell_reference(x, iteration, hidden, params, *, kernel_size):
    """Pure-JAX reference (lax conv, NCHW/OIHW) for correctness checking."""
    pad = kernel_size // 2
    dn = ("NCHW", "OIHW", "NCHW")

    def conv(a, w, b):
        y = jax.lax.conv_general_dilated(
            a, w, window_strides=(1, 1),
            padding=((pad, pad), (pad, pad)),
            dimension_numbers=dn)
        return y + b.reshape(1, -1, 1, 1)

    y = (conv(x, params["w_i2h"], params["b_i2h"])
         + conv(iteration, params["w_ih2ih"], params["b_ih2ih"])
         + conv(hidden, params["w_h2h"], params["b_h2h"]))
    return jnp.maximum(y, 0.0)


def init_params(key, input_size, hidden_size, kernel_size):
    """Deterministic synthetic init (PyTorch-style OIHW weights, uniform bounds)."""
    ks = jax.random.split(key, 6)
    K = kernel_size

    def u(k, shape, fan_in):
        bound = 1.0 / jnp.sqrt(fan_in)
        return jax.random.uniform(k, shape, jnp.float32, -bound, bound)

    fi = input_size * K * K
    fh = hidden_size * K * K
    return {
        "w_i2h":   u(ks[0], (hidden_size, input_size, K, K), fi),
        "b_i2h":   u(ks[1], (hidden_size,), fi),
        "w_h2h":   u(ks[2], (hidden_size, hidden_size, K, K), fh),
        "b_h2h":   u(ks[3], (hidden_size,), fh),
        "w_ih2ih": u(ks[4], (hidden_size, hidden_size, K, K), fh),
        "b_ih2ih": u(ks[5], (hidden_size,), fh),
    }


if __name__ == "__main__":
    B, CIN, H, W = 2, 4, 16, 16
    CH = 8
    K = 3

    key = jax.random.PRNGKey(0)
    k_x, k_it, k_h, k_p = jax.random.split(key, 4)

    # PyTorch-style NCHW inputs (no transposes needed by this kernel).
    x = jax.random.normal(k_x, (B, CIN, H, W), jnp.float32)
    it = jax.random.normal(k_it, (B, CH, H, W), jnp.float32)
    h = jax.random.normal(k_h, (B, CH, H, W), jnp.float32)

    params = init_params(k_p, CIN, CH, K)

    out = echo_cell_pallas(x, it, h, params, kernel_size=K)
    out = jax.block_until_ready(out)

    ref = echo_cell_reference(x, it, h, params, kernel_size=K)
    assert out.shape == (B, CH, H, W)
    # bf16 streaming operands with f32 accumulation -> ~1e-2-class relative error.
    assert jnp.allclose(out, ref, atol=5e-2, rtol=5e-2), "mismatch vs reference"

    print("KERNEL_OK")
</pallas_src>

<mosaic_0001>
module attributes {stable_mosaic.version = 11 : i64} {
  func.func @_echo_kernel(%arg0: i32, %arg1: memref<1x20x384xbf16, #tpu.memory_space<vmem>>, %arg2: memref<9x8x20xbf16, #tpu.memory_space<vmem>>, %arg3: memref<8x1xf32, #tpu.memory_space<vmem>>, %arg4: memref<1x8x288xf32, #tpu.memory_space<vmem>>) attributes {dimension_semantics = [#tpu.dimension_semantics<parallel>], iteration_bounds = array<i64: 2>, scalar_prefetch = 0 : i64, scratch_operands = 0 : i64, tpu.core_type = #tpu.core_type<tc>, window_params = [{transform_indices = @transform_0, window_bounds = array<i64: 1, 20, 384>}, {pipeline_mode = #tpu.pipeline_mode<synchronous>, transform_indices = @transform_1, window_bounds = array<i64: 9, 8, 20>}, {pipeline_mode = #tpu.pipeline_mode<synchronous>, transform_indices = @transform_2, window_bounds = array<i64: 8, 1>}, {transform_indices = @transform_3, window_bounds = array<i64: 1, 8, 288>}]} {
    %c0 = arith.constant 0 : index
    %c0_0 = arith.constant 0 : index
    %c0_1 = arith.constant 0 : index
    %0 = vector.load %arg1[%c0, %c0_0, %c0_1] : memref<1x20x384xbf16, #tpu.memory_space<vmem>>, vector<1x20x384xbf16>
    %1 = vector.shape_cast %0 : vector<1x20x384xbf16> to vector<20x384xbf16>
    %c0_2 = arith.constant 0 : index
    %c0_3 = arith.constant 0 : index
    %c0_4 = arith.constant 0 : index
    %2 = vector.load %arg2[%c0_2, %c0_3, %c0_4] : memref<9x8x20xbf16, #tpu.memory_space<vmem>>, vector<1x8x20xbf16>
    %3 = vector.shape_cast %2 : vector<1x8x20xbf16> to vector<8x20xbf16>
    %4 = vector.extract_strided_slice %1 {offsets = [0, 0], sizes = [20, 288], strides = [1, 1]} : vector<20x384xbf16> to vector<20x288xbf16>
    %cst = arith.constant dense<0.000000e+00> : vector<8x288xf32>
    %5 = tpu.matmul %3, %4, %cst {dimension_numbers = #tpu.dot_dimension_numbers<[1], [0], [0], [1], [0, 0, 1, 1], [], []>} : vector<8x20xbf16>, vector<20x288xbf16>, vector<8x288xf32> -> vector<8x288xf32>
    %c1 = arith.constant 1 : index
    %c0_5 = arith.constant 0 : index
    %c0_6 = arith.constant 0 : index
    %6 = vector.load %arg2[%c1, %c0_5, %c0_6] : memref<9x8x20xbf16, #tpu.memory_space<vmem>>, vector<1x8x20xbf16>
    %7 = vector.shape_cast %6 : vector<1x8x20xbf16> to vector<8x20xbf16>
    %8 = vector.extract_strided_slice %1 {offsets = [0, 1], sizes = [20, 288], strides = [1, 1]} : vector<20x384xbf16> to vector<20x288xbf16>
    %cst_7 = arith.constant dense<0.000000e+00> : vector<8x288xf32>
    %9 = tpu.matmul %7, %8, %cst_7 {dimension_numbers = #tpu.dot_dimension_numbers<[1], [0], [0], [1], [0, 0, 1, 1], [], []>} : vector<8x20xbf16>, vector<20x288xbf16>, vector<8x288xf32> -> vector<8x288xf32>
    %10 = arith.addf %5, %9 : vector<8x288xf32>
    %c2 = arith.constant 2 : index
    %c0_8 = arith.constant 0 : index
    %c0_9 = arith.constant 0 : index
    %11 = vector.load %arg2[%c2, %c0_8, %c0_9] : memref<9x8x20xbf16, #tpu.memory_space<vmem>>, vector<1x8x20xbf16>
    %12 = vector.shape_cast %11 : vector<1x8x20xbf16> to vector<8x20xbf16>
    %13 = vector.extract_strided_slice %1 {offsets = [0, 2], sizes = [20, 288], strides = [1, 1]} : vector<20x384xbf16> to vector<20x288xbf16>
    %cst_10 = arith.constant dense<0.000000e+00> : vector<8x288xf32>
    %14 = tpu.matmul %12, %13, %cst_10 {dimension_numbers = #tpu.dot_dimension_numbers<[1], [0], [0], [1], [0, 0, 1, 1], [], []>} : vector<8x20xbf16>, vector<20x288xbf16>, vector<8x288xf32> -> vector<8x288xf32>
    %15 = arith.addf %10, %14 : vector<8x288xf32>
    %c3 = arith.constant 3 : index
    %c0_11 = arith.constant 0 : index
    %c0_12 = arith.constant 0 : index
    %16 = vector.load %arg2[%c3, %c0_11, %c0_12] : memref<9x8x20xbf16, #tpu.memory_space<vmem>>, vector<1x8x20xbf16>
    %17 = vector.shape_cast %16 : vector<1x8x20xbf16> to vector<8x20xbf16>
    %18 = vector.extract_strided_slice %1 {offsets = [0, 18], sizes = [20, 288], strides = [1, 1]} : vector<20x384xbf16> to vector<20x288xbf16>
    %cst_13 = arith.constant dense<0.000000e+00> : vector<8x288xf32>
    %19 = tpu.matmul %17, %18, %cst_13 {dimension_numbers = #tpu.dot_dimension_numbers<[1], [0], [0], [1], [0, 0, 1, 1], [], []>} : vector<8x20xbf16>, vector<20x288xbf16>, vector<8x288xf32> -> vector<8x288xf32>
    %20 = arith.addf %15, %19 : vector<8x288xf32>
    %c4 = arith.constant 4 : index
    %c0_14 = arith.constant 0 : index
    %c0_15 = arith.constant 0 : index
    %21 = vector.load %arg2[%c4, %c0_14, %c0_15] : memref<9x8x20xbf16, #tpu.memory_space<vmem>>, vector<1x8x20xbf16>
    %22 = vector.shape_cast %21 : vector<1x8x20xbf16> to vector<8x20xbf16>
    %23 = vector.extract_strided_slice %1 {offsets = [0, 19], sizes = [20, 288], strides = [1, 1]} : vector<20x384xbf16> to vector<20x288xbf16>
    %cst_16 = arith.constant dense<0.000000e+00> : vector<8x288xf32>
    %24 = tpu.matmul %22, %23, %cst_16 {dimension_numbers = #tpu.dot_dimension_numbers<[1], [0], [0], [1], [0, 0, 1, 1], [], []>} : vector<8x20xbf16>, vector<20x288xbf16>, vector<8x288xf32> -> vector<8x288xf32>
    %25 = arith.addf %20, %24 : vector<8x288xf32>
    %c5 = arith.constant 5 : index
    %c0_17 = arith.constant 0 : index
    %c0_18 = arith.constant 0 : index
    %26 = vector.load %arg2[%c5, %c0_17, %c0_18] : memref<9x8x20xbf16, #tpu.memory_space<vmem>>, vector<1x8x20xbf16>
    %27 = vector.shape_cast %26 : vector<1x8x20xbf16> to vector<8x20xbf16>
    %28 = vector.extract_strided_slice %1 {offsets = [0, 20], sizes = [20, 288], strides = [1, 1]} : vector<20x384xbf16> to vector<20x288xbf16>
    %cst_19 = arith.constant dense<0.000000e+00> : vector<8x288xf32>
    %29 = tpu.matmul %27, %28, %cst_19 {dimension_numbers = #tpu.dot_dimension_numbers<[1], [0], [0], [1], [0, 0, 1, 1], [], []>} : vector<8x20xbf16>, vector<20x288xbf16>, vector<8x288xf32> -> vector<8x288xf32>
    %30 = arith.addf %25, %29 : vector<8x288xf32>
    %c6 = arith.constant 6 : index
    %c0_20 = arith.constant 0 : index
    %c0_21 = arith.constant 0 : index
    %31 = vector.load %arg2[%c6, %c0_20, %c0_21] : memref<9x8x20xbf16, #tpu.memory_space<vmem>>, vector<1x8x20xbf16>
    %32 = vector.shape_cast %31 : vector<1x8x20xbf16> to vector<8x20xbf16>
    %33 = vector.extract_strided_slice %1 {offsets = [0, 36], sizes = [20, 288], strides = [1, 1]} : vector<20x384xbf16> to vector<20x288xbf16>
    %cst_22 = arith.constant dense<0.000000e+00> : vector<8x288xf32>
    %34 = tpu.matmul %32, %33, %cst_22 {dimension_numbers = #tpu.dot_dimension_numbers<[1], [0], [0], [1], [0, 0, 1, 1], [], []>} : vector<8x20xbf16>, vector<20x288xbf16>, vector<8x288xf32> -> vector<8x288xf32>
    %35 = arith.addf %30, %34 : vector<8x288xf32>
    %c7 = arith.constant 7 : index
    %c0_23 = arith.constant 0 : index
    %c0_24 = arith.constant 0 : index
    %36 = vector.load %arg2[%c7, %c0_23, %c0_24] : memref<9x8x20xbf16, #tpu.memory_space<vmem>>, vector<1x8x20xbf16>
    %37 = vector.shape_cast %36 : vector<1x8x20xbf16> to vector<8x20xbf16>
    %38 = vector.extract_strided_slice %1 {offsets = [0, 37], sizes = [20, 288], strides = [1, 1]} : vector<20x384xbf16> to vector<20x288xbf16>
    %cst_25 = arith.constant dense<0.000000e+00> : vector<8x288xf32>
    %39 = tpu.matmul %37, %38, %cst_25 {dimension_numbers = #tpu.dot_dimension_numbers<[1], [0], [0], [1], [0, 0, 1, 1], [], []>} : vector<8x20xbf16>, vector<20x288xbf16>, vector<8x288xf32> -> vector<8x288xf32>
    %40 = arith.addf %35, %39 : vector<8x288xf32>
    %c8 = arith.constant 8 : index
    %c0_26 = arith.constant 0 : index
    %c0_27 = arith.constant 0 : index
    %41 = vector.load %arg2[%c8, %c0_26, %c0_27] : memref<9x8x20xbf16, #tpu.memory_space<vmem>>, vector<1x8x20xbf16>
    %42 = vector.shape_cast %41 : vector<1x8x20xbf16> to vector<8x20xbf16>
    %43 = vector.extract_strided_slice %1 {offsets = [0, 38], sizes = [20, 288], strides = [1, 1]} : vector<20x384xbf16> to vector<20x288xbf16>
    %cst_28 = arith.constant dense<0.000000e+00> : vector<8x288xf32>
    %44 = tpu.matmul %42, %43, %cst_28 {dimension_numbers = #tpu.dot_dimension_numbers<[1], [0], [0], [1], [0, 0, 1, 1], [], []>} : vector<8x20xbf16>, vector<20x288xbf16>, vector<8x288xf32> -> vector<8x288xf32>
    %45 = arith.addf %40, %44 : vector<8x288xf32>
    %c0_29 = arith.constant 0 : index
    %c0_30 = arith.constant 0 : index
    %46 = vector.load %arg3[%c0_29, %c0_30] : memref<8x1xf32, #tpu.memory_space<vmem>>, vector<8x1xf32>
    %47 = vector.broadcast %46 : vector<8x1xf32> to vector<8x288xf32>
    %48 = arith.addf %45, %47 : vector<8x288xf32>
    %cst_31 = arith.constant 0.000000e+00 : f32
    %49 = vector.broadcast %cst_31 : f32 to vector<8x288xf32>
    %50 = arith.maximumf %48, %49 : vector<8x288xf32>
    %c0_32 = arith.constant 0 : index
    %c0_33 = arith.constant 0 : index
    %c0_34 = arith.constant 0 : index
    %51 = vector.load %arg4[%c0_32, %c0_33, %c0_34] : memref<1x8x288xf32, #tpu.memory_space<vmem>>, vector<1x8x288xf32>
    %52 = vector.shape_cast %51 : vector<1x8x288xf32> to vector<8x288xf32>
    %53 = vector.shape_cast %50 : vector<8x288xf32> to vector<1x8x288xf32>
    tpu.vector_store %arg4[%c0_32, %c0_33, %c0_34], %53 {strides = array<i32>} : memref<1x8x288xf32, #tpu.memory_space<vmem>>, vector<1x8x288xf32>,
    return
  }
  func.func @transform_0(%arg0: i32) -> (i32, i32, i32) {
    %c0_i32 = arith.constant 0 : i32
    %c0_i32_0 = arith.constant 0 : i32
    %c0_i32_1 = arith.constant 0 : i32
    return %arg0, %c0_i32, %c0_i32_0 : i32, i32, i32
  }
  func.func @transform_1(%arg0: i32) -> (i32, i32, i32) {
    %c0_i32 = arith.constant 0 : i32
    %c0_i32_0 = arith.constant 0 : i32
    %c0_i32_1 = arith.constant 0 : i32
    %c0_i32_2 = arith.constant 0 : i32
    return %c0_i32, %c0_i32_0, %c0_i32_1 : i32, i32, i32
  }
  func.func @transform_2(%arg0: i32) -> (i32, i32) {
    %c0_i32 = arith.constant 0 : i32
    %c0_i32_0 = arith.constant 0 : i32
    %c0_i32_1 = arith.constant 0 : i32
    return %c0_i32, %c0_i32_0 : i32, i32
  }
  func.func @transform_3(%arg0: i32) -> (i32, i32, i32) {
    %c0_i32 = arith.constant 0 : i32
    %c0_i32_0 = arith.constant 0 : i32
    %c0_i32_1 = arith.constant 0 : i32
    return %arg0, %c0_i32, %c0_i32_0 : i32, i32, i32
  }
}

</mosaic_0001>

<bundles_post_ra>
// kernel: tpu_custom_call.1
= control target key start
LH: loop header
LB: loop body
LE: loop exit
PB: predicated region body
PF: predicated region fallthrough
CT: control target
= control target key end

     0   :  { %8 = vsyncpa [#allocation3], 0  ;;  %s1430_s0 = inlined_call_operand.vmem [shape: bf16[2,20,384], index: 0, kind: input, shape index: {}]   ;;  %s1431_s1 = inlined_call_operand.vmem [shape: bf16[9,8,20], index: 1, kind: input, shape index: {}]   ;;  %s1432_s2 = inlined_call_operand.vmem [shape: f32[8,1], index: 2, kind: input, shape index: {}]   ;;  %s1433_s3 = inlined_call_operand.hbm [shape: f32[2,8,288], index: 3, kind: output, shape index: {}]  }
   0x1   :  { %10 = vsyncpa [#allocation3 + $0x1], 0  ;;  %s1154_s12 = smov 0   ;;  %s1156_s13 = smov 0  }
   0x2   :  { %s1158_s14 = smov 0   ;;  %s1160_s15 = smov 0  }
   0x3 LB: > { %s1175_s16 = sadd.s32 4294967295, %s1123_s15   ;;  %s951_s17 = sadd.s32 4294967294, %s1123_s15   ;;  %s1123_s15 = sphi %s1160_s15, %s1439_s15   ;;  %s1119_s14 = sphi %s1158_s14, %s1438_s14   ;;  %s1115_s13 = sphi %s1156_s13, %s1437_s13   ;;  %s1111_s12 = sphi %s1154_s12, %s1436_s12  }
   0x4   : > { %s1179_s18 = sadd.s32 1, %s1123_s15   ;;  %s91_s19 = sadd.s32 1, %s1119_s14 }
   0x5   : > { %s88_s20 = ssub.s32 %s1123_s15, %s1179_s18  ;;  %p101_p0 = scmp.ne.s32.totalorder %s1119_s14, %s1115_s13 }
   0x6   : > { %p89_p1 = scmp.eq.s32.totalorder %s88_s20, 0  ;;  %p102_p2 = scmp.eq.s32.totalorder %s1175_s16, 1 }
   0x7   : > { %p107_p3 = scmp.ne.s32.totalorder %s1115_s13, %s1111_s12  ;;  %p108_p4 = scmp.eq.s32.totalorder %s951_s17, 1 }
   0x8   : > { %s1190_s21 = scalar_select %p89_p1, %s1119_s14, %s91_s19  }
   0x9   : > { %p1192_p5 = por %p102_p2, %p101_p0  ;;  %p1196_p6 = por %p108_p4, %p107_p3 }
   0xa   : > { %p954_p7 = scmp.ge.s32.totalorder %s1123_s15, 1  ;;  %p140_p8 = scmp.lt.s32.totalorder %s1123_s15, 3 }
   0xc   : > { %p141_p9 = pnand %p954_p7, %p140_p8 }
   0xd   : > { %p164_p10 = scmp.lt.s32.totalorder (!%p141_p9), %s1175_s16, 1  ;;  %s1125_s29 = smov (!%p141_p9), 127  }
   0xe   : > { %144 = sbr.rel (%p141_p9) target bundleno = 409 (0x199), region = 32  ;;  %s1126_s30 = smov (!%p141_p9), 126  }
   0xf   : > { %s1127_s4 = smov (!%p141_p9), 110   ;;  %s1128_s5 = smov (!%p141_p9), 109  }
  0x10   : > { %s1129_s6 = smov (!%p141_p9), 108   ;;  %s1130_s7 = smov (!%p141_p9), 92  }
  0x11   : > { %s1131_s8 = smov (!%p141_p9), 91   ;;  %s1132_s11 = smov (!%p141_p9), 90  }
  0x12   : > { %s161_s17 = sand.u32 (!%p141_p9), 1, %s1115_s13   ;;  %s1011_s20 = smul.u32 (!%p141_p9), 24, %s1175_s16 }
  0x13   : > { %s165_s24 = scalar_select %p164_p10, %s1175_s16, 1  ;;  %vm224_vm0 = vcmask 1041408   ;;  %vm220_vm1 = vcmask 162816   ;;  %v1264_v20 = vld [vmem:[%s1431_s1] sm:$0xf]  ;;  %vm212_vm2 = vcmask 1039360  }
  0x14   : > { %v956_v33 = vld [vmem:[%s1431_s1 + $0x4] sm:$0xf]  ;;  %vm341_vm3 = vcmask 1031168   ;;  %vm417_vm4 = vcmask 900096   ;;  %v975_v50 = vld [vmem:[%s1431_s1 + $0x8] sm:$0xf]  ;;  %s887_s26 = scalar_lea.hbm %s1433_s3, %s1011_s20 }
  0x15   : > { %s1010_s25 = smul.u32 36, %s165_s24  ;;  %vm493_vm5 = vcmask 891904   ;;  %vm569_vm6 = vcmask 883712   ;;  %vm645_vm7 = vcmask 752640   ;;  %vm721_vm8 = vcmask 744448  }
  0x16   : > { %vm797_vm9 = vcmask 736256   ;;  %s1009_s19 = smul.u32 24, %s161_s17  ;;  %vm873_vm10 = vcmask 261120  }
  0x17   : > { %s168_s28 = scalar_lea.vmem %s1430_s0, %s1010_s25 }
  0x18   : > { %v967_v0 = vld [vmem:[%s168_s28 + $0x8] sm:$0xf]  ;;  %v1008_v1 = vld [vmem:[%s168_s28 + $0x10] sm:$0xf0]  ;;  %v174_v2 = vld [vmem:[%s168_s28 + $0x18] sm:$0x33] }
  0x19   : > { %v1207_v3 = vor.u32 %v1008_v1, %v967_v0  ;;  %v191_v4 = vunpack.c.l.b16 %v174_v2  ;;  %v175_v5 = vld [vmem:[%s168_s28 + $0x20] sm:$0x3]  ;;  %v1007_v7 = vld [vmem:[%s168_s28 + $0x8] sm:$0xf0]  ;;  %v192_v11 = vunpack.c.h.b16 %v174_v2  ;;  %v1006_v12 = vld [vmem:[%s168_s28 + $0x4] sm:$0xf] }
  0x1a   : > { %v959_v6 = vld [vmem:[%s168_s28] sm:$0xf]  ;;  %v193_v10 = vunpack.c.l.b16 %v175_v5  ;;  %v961_v13 = vld [vmem:[%s168_s28 + $0xc] sm:$0xf0]  ;;  %v979_v0 = vld [vmem:[%s1431_s1 + $0xc] sm:$0xf] }
  0x1b   : > { %v1209_v8 = vor.u32 %v1007_v7, %v959_v6  ;;  %204 = vrot.lane.b32.xlu0 %v1207_v3, %s1125_s29  ;;  %v1212_v9 = vpack.c.b16 %v191_v4, %v191_v4  ;;  %v1218_v15 = vor.u32 %v1006_v12, %v961_v13  ;;  %v1220_v16 = vpack.c.b16 %v192_v11, %v192_v11  ;;  %s163_s16 = scalar_lea.vmem [#allocation2], %s1009_s19  ;;  %s891_s28 = sshll.u32 %s887_s26, 4  ;;  %s892_s28 = int_to_ptr.hbm [resolvable:$true] %s891_s28 }
  0x1c   : > { %v1216_v14 = vpack.c.b16 %v193_v10, %v193_v10  ;;  %s889_s27 = sshll.u32 %s163_s16, 4  ;;  %s890_s27 = int_to_ptr.vmem [resolvable:$true] %s889_s27 }
  0x1d   : > { %200 = vrot.lane.b32.xlu2 %v1209_v8, %s1125_s29  ;;  %206 = vrot.lane.b32.xlu1 %v1212_v9, %s1125_s29  ;;  %v280_v18 = vsel %vm224_vm0, %v1212_v9, 0  ;;  %v283_v34 = vsel %vm224_vm0, %v1220_v16, 0 }
  0x1e   : > { %294 = vmatpush.bf16.msra.mxu3 %v280_v18  ;;  %v286_v38 = vsel %vm224_vm0, %v1216_v14, 0 }
  0x22   : > { %295 = vmatpush.bf16.msra.mxu3 %v1209_v8 }
  0x23   : > { %210 = vrot.lane.b32.xlu0 %v1216_v14, %s1125_s29 }
  0x25   : > { %202 = vrot.lane.b32.xlu2 %v1218_v15, %s1125_s29  ;;  %208 = vrot.lane.b32.xlu1 %v1220_v16, %s1125_s29  ;;  %s876_s29 = scalar_lea.sflag [#allocation3], %s161_s17 }
  0x26   : > { %972 = vmatmul.msk.bf16.vlgmr.msra.gmra.mxu3 %vm220_vm1, %v1264_v20 }
  0x2b   : > { %335 = vrot.lane.b32.xlu0 %v1212_v9, %s1126_s30 }
  0x2d   : > { %329 = vrot.lane.b32.xlu2 %v1209_v8, %s1126_s30  ;;  %337 = vrot.lane.b32.xlu1 %v1220_v16, %s1126_s30 }
  0x33   : > { %331 = vrot.lane.b32.xlu0 %v1218_v15, %s1126_s30 }
  0x35   : > { %413 = vrot.lane.b32.xlu2 %v1220_v16, %s1127_s4  ;;  %339 = vrot.lane.b32.xlu1 %v1216_v14, %s1126_s30 }
  0x3b   : > { %415 = vrot.lane.b32.xlu0 %v1216_v14, %s1127_s4 }
  0x3d   : > { %407 = vrot.lane.b32.xlu2 %v1218_v15, %s1127_s4  ;;  %333 = vrot.lane.b32.xlu1 %v1207_v3, %s1126_s30  ;;  %s1075_s30 = sshra.s32 %s892_s28, 4  ;;  %s1076_s30 = int_to_ptr.hbm [resolvable:$true] %s1075_s30 }
  0x3e   : > { %p1082_p0 = scmp.lt.s32.totalorder %s1076_s30, %s1433_s3 }
  0x43   : > { %409 = vrot.lane.b32.xlu0 %v1207_v3, %s1127_s4 }
  0x45   : > { %405 = vrot.lane.b32.xlu2 %v1209_v8, %s1127_s4  ;;  %411 = vrot.lane.b32.xlu1 %v1212_v9, %s1127_s4  ;;  %s1077_s4 = scalar_lea.hbm %s1076_s30, 24 }
  0x46   : > { %p1078_p11 = scmp.ne.s32.totalorder %s1076_s30, %s1077_s4 }
  0x48   : > { %p1079_p12 = pnand %p1078_p11, %p1192_p5 }
  0x4a   : > { %p1080_p13 = pneg %p1079_p12 }
  0x4b   : > { %491 = vrot.lane.b32.xlu0 %v1216_v14, %s1128_s5 }
  0x4d   : > { %487 = vrot.lane.b32.xlu2 %v1212_v9, %s1128_s5  ;;  %485 = vrot.lane.b32.xlu1 %v1207_v3, %s1128_s5 }
  0x53   : > { %489 = vrot.lane.b32.xlu0 %v1220_v16, %s1128_s5 }
  0x55   : > { %483 = vrot.lane.b32.xlu2 %v1218_v15, %s1128_s5  ;;  %481 = vrot.lane.b32.xlu1 %v1209_v8, %s1128_s5 }
  0x5b   : > { %563 = vrot.lane.b32.xlu0 %v1212_v9, %s1129_s6 }
  0x5d   : > { %639 = vrot.lane.b32.xlu2 %v1212_v9, %s1130_s7  ;;  %565 = vrot.lane.b32.xlu1 %v1220_v16, %s1129_s6 }
  0x63   : > { %641 = vrot.lane.b32.xlu0 %v1220_v16, %s1130_s7 }
  0x65   : > { %559 = vrot.lane.b32.xlu2 %v1218_v15, %s1129_s6  ;;  %557 = vrot.lane.b32.xlu1 %v1209_v8, %s1129_s6 }
  0x6b   : > { %633 = vrot.lane.b32.xlu0 %v1209_v8, %s1130_s7 }
  0x6d   : > { %567 = vrot.lane.b32.xlu2 %v1216_v14, %s1129_s6  ;;  %635 = vrot.lane.b32.xlu1 %v1218_v15, %s1130_s7 }
  0x73   : > { %561 = vrot.lane.b32.xlu0 %v1207_v3, %s1129_s6 }
  0x75   : > { %717 = vrot.lane.b32.xlu2 %v1220_v16, %s1131_s8  ;;  %643 = vrot.lane.b32.xlu1 %v1216_v14, %s1130_s7 }
  0x77   : > { %v201_v17 = vpop.permute.xlu2 %200 }
  0x7b   : > { %719 = vrot.lane.b32.xlu0 %v1216_v14, %s1131_s8 }
  0x7d   : > { %711 = vrot.lane.b32.xlu2 %v1218_v15, %s1131_s8  ;;  %637 = vrot.lane.b32.xlu1 %v1207_v3, %s1130_s7  ;;  %s1081_s7 = scalar_lea.hbm %s1433_s3, 48 }
  0x7e   : > { %p1083_p1 = scmp.lt.s32.totalorder %s1081_s7, %s1077_s4 }
  0x7f   : > { %v203_v19 = vpop.permute.xlu2 %202 }
  0x80   : > { %v213_v36 = vsel %vm212_vm2, %v201_v17, %v203_v19  ;;  %p1084_p2 = por %p1083_p1, %p1082_p0 }
  0x82   : > { %p1085_p3 = pnand %p1084_p2, %p1080_p13 }
  0x83   : > { %713 = vrot.lane.b32.xlu0 %v1207_v3, %s1131_s8 }
  0x85   : > { %709 = vrot.lane.b32.xlu2 %v1209_v8, %s1131_s8  ;;  %715 = vrot.lane.b32.xlu1 %v1212_v9, %s1131_s8 }
  0x87   : > { %v330_v21 = vpop.permute.xlu2 %329 }
  0x8b   : > { %795 = vrot.lane.b32.xlu0 %v1216_v14, %s1132_s11 }
  0x8d   : > { %791 = vrot.lane.b32.xlu2 %v1212_v9, %s1132_s11  ;;  %v205_v22 = vpop.permute.xlu0 %204  ;;  %789 = vrot.lane.b32.xlu1 %v1207_v3, %s1132_s11 }
  0x8e   : > { %v214_v37 = vsel %vm212_vm2, %v203_v19, %v205_v22 }
  0x8f   : > { %v1274_v23 = vpop.permute.xlu2 %413  ;;  %v207_v24 = vpop.permute.xlu1 %206 }
  0x93   : > { %793 = vrot.lane.b32.xlu0 %v1220_v16, %s1132_s11  ;;  %v983_v16 = vld [vmem:[%s1431_s1 + $0x10] sm:$0xf] }
  0x95   : > { %787 = vrot.lane.b32.xlu2 %v1218_v15, %s1132_s11  ;;  %v211_v25 = vpop.permute.xlu0 %210  ;;  %785 = vrot.lane.b32.xlu1 %v1209_v8, %s1132_s11 }
  0x96   : > { %v232_v26 = vsel %vm224_vm0, %v211_v25, 0 }
  0x97   : > { %v1280_v27 = vpop.permute.xlu2 %407  ;;  %v209_v28 = vpop.permute.xlu1 %208  ;;  %266 = vmatpush.bf16.msra.mxu2 %v232_v26 }
  0x98   : > { %v215_v29 = vsel %vm212_vm2, %v207_v24, %v209_v28  ;;  %v216_v30 = vsel %vm212_vm2, %v209_v28, %v211_v25  ;;  %v987_v28 = vld [vmem:[%s1431_s1 + $0x14] sm:$0xf] }
  0x99   : > { %v226_v31 = vsel %vm224_vm0, %v215_v29, 0  ;;  %v229_v32 = vsel %vm224_vm0, %v216_v30, 0 }
  0x9a   : > { %240 = vmatpush.bf16.msra.mxu0 %v226_v31  ;;  %253 = vmatpush.bf16.msra.mxu1 %v229_v32 }
  0x9b   : > { %267 = vmatpush.bf16.msra.mxu2 %v205_v22 }
  0x9d   : > { %v336_v35 = vpop.permute.xlu0 %335 }
  0x9e   : > { %241 = vmatpush.bf16.msra.mxu0 %v213_v36  ;;  %254 = vmatpush.bf16.msra.mxu1 %v214_v37 }
  0x9f   : > { %v406_v39 = vpop.permute.xlu2 %405  ;;  %971 = vmatmul.msk.bf16.vlgmr.msra.gmra.mxu2 %vm220_vm1, %v956_v33  ;;  %v338_v40 = vpop.permute.xlu1 %337 }
  0xa0   : > { %v344_v41 = vsel %vm341_vm3, %v336_v35, %v338_v40  ;;  %v418_v2 = vsel %vm417_vm4, %v406_v39, %v1280_v27 }
  0xa1   : > { %969 = vmatmul.msk.bf16.vlgmr.msra.gmra.mxu0 %vm220_vm1, %v956_v33  ;;  %970 = vmatmul.msk.bf16.vlgmr.msra.gmra.mxu1 %vm220_vm1, %v956_v33  ;;  %v353_v42 = vsel %vm224_vm0, %v344_v41, 0  ;;  %v991_v33 = vld [vmem:[%s1431_s1 + $0x18] sm:$0xf] }
  0xa2   : > { %307 = vmatpush.bf16.msrb.mxu0 %v283_v34  ;;  %320 = vmatpush.bf16.msrb.mxu1 %v286_v38 }
  0xa3   : > { %367 = vmatpush.bf16.msrb.mxu2 %v353_v42 }
  0xa5   : > { %v332_v43 = vpop.permute.xlu0 %331 }
  0xa6   : > { %308 = vmatpush.bf16.msrb.mxu0 %v1218_v15  ;;  %321 = vmatpush.bf16.msrb.mxu1 %v1207_v3  ;;  %v342_v44 = vsel %vm341_vm3, %v330_v21, %v332_v43 }
  0xa7   : > { %v488_v45 = vpop.permute.xlu2 %487  ;;  %v340_v46 = vpop.permute.xlu1 %339  ;;  %368 = vmatpush.bf16.msrb.mxu2 %v342_v44 }
  0xa8   : > { %v359_v47 = vsel %vm224_vm0, %v340_v46, 0  ;;  %v345_v48 = vsel %vm341_vm3, %v338_v40, %v340_v46 }
  0xa9   : > { %v356_v49 = vsel %vm224_vm0, %v345_v48, 0  ;;  %v1133_v48 = vmov 0  }
  0xaa   : > { %393 = vmatpush.bf16.msra.mxu0 %v359_v47  ;;  %380 = vmatpush.bf16.msrb.mxu3 %v356_v49  ;;  %v859_v47 = vld [vmem:[%s1432_s2] sm:$0xff] }
  0xab   : > { %1060 = vset.pattern.permute.xlu0 %v1133_v48 }
  0xac   : > { %862 = vperm.xlu0 %1060, %v859_v47  }
  0xad   : > { %v416_v51 = vpop.permute.xlu0 %415 }
  0xae   : > { %v421_v52 = vsel %vm417_vm4, %v1274_v23, %v416_v51  ;;  %v435_v57 = vsel %vm224_vm0, %v416_v51, 0 }
  0xaf   : > { %v484_v53 = vpop.permute.xlu2 %483  ;;  %v432_v54 = vsel %vm224_vm0, %v421_v52, 0  ;;  %976 = vmatmul.msk.bf16.vlgmr.msrb.gmra.mxu2 %vm220_vm1, %v975_v50  ;;  %v334_v55 = vpop.permute.xlu1 %333 }
  0xb0   : > { %394 = vmatpush.bf16.msra.mxu0 %v334_v55  ;;  %v343_v56 = vsel %vm341_vm3, %v332_v43, %v334_v55  ;;  %456 = vmatpush.bf16.msra.mxu2 %v432_v54  ;;  %v995_v54 = vld [vmem:[%s1431_s1 + $0x1c] sm:$0xf] }
  0xb1   : > { %973 = vmatmul.msk.bf16.vlgmr.msrb.gmra.mxu0 %vm220_vm1, %v1264_v20  ;;  %974 = vmatmul.msk.bf16.vlgmr.msrb.gmra.mxu1 %vm220_vm1, %v1264_v20 }
  0xb2   : > { %381 = vmatpush.bf16.msrb.mxu3 %v343_v56 }
  0xb5   : > { %977 = vmatmul.msk.bf16.vlgmr.msrb.gmra.mxu3 %vm220_vm1, %v975_v50  ;;  %v410_v58 = vpop.permute.xlu0 %409 }
  0xb6   : > { %469 = vmatpush.bf16.msra.mxu3 %v435_v57  ;;  %v419_v59 = vsel %vm417_vm4, %v1280_v27, %v410_v58 }
  0xb7   : > { %v640_v60 = vpop.permute.xlu2 %639  ;;  %v412_v61 = vpop.permute.xlu1 %411  ;;  %457 = vmatpush.bf16.msra.mxu2 %v419_v59 }
  0xb8   : > { %v420_v62 = vsel %vm417_vm4, %v412_v61, %v1274_v23 }
  0xb9   : > { %v429_v63 = vsel %vm224_vm0, %v420_v62, 0 }
  0xba   : > { %470 = vmatpush.bf16.msra.mxu3 %v410_v58  ;;  %443 = vmatpush.bf16.msra.mxu1 %v429_v63 }
  0xbd   : > { %v492_v1 = vpop.permute.xlu0 %491 }
  0xbe   : > { %v511_v3 = vsel %vm224_vm0, %v492_v1, 0  ;;  %444 = vmatpush.bf16.msra.mxu1 %v418_v2 }
  0xbf   : > { %981 = vmatmul.msk.bf16.vlgmr.msra.gmra.mxu2 %vm220_vm1, %v979_v0  ;;  %v486_v4 = vpop.permute.xlu1 %485  ;;  %v560_v5 = vpop.permute.xlu2 %559 }
  0xc0   : > { %545 = vmatpush.bf16.msrb.mxu2 %v511_v3  ;;  %v495_v15 = vsel %vm493_vm5, %v484_v53, %v486_v4 }
  0xc1   : > { %978 = vmatmul.msk.bf16.vlgmr.msra.gmra.mxu0 %vm220_vm1, %v975_v50  ;;  %980 = vmatmul.msk.bf16.vlgmr.msra.gmra.mxu1 %vm220_vm1, %v979_v0 }
  0xc4   : > { %546 = vmatpush.bf16.msrb.mxu2 %v486_v4 }
  0xc5   : > { %982 = vmatmul.msk.bf16.vlgmr.msra.gmra.mxu3 %vm220_vm1, %v979_v0  ;;  %v490_v6 = vpop.permute.xlu0 %489  ;;  %v297_v0 = vpop.f32.mrf.mxu3 }
  0xc6   : > { %v496_v7 = vsel %vm493_vm5, %v488_v45, %v490_v6  ;;  %v497_v8 = vsel %vm493_vm5, %v490_v6, %v492_v1 }
  0xc7   : > { %v505_v9 = vsel %vm224_vm0, %v496_v7, 0  ;;  %v508_v10 = vsel %vm224_vm0, %v497_v8, 0  ;;  %v482_v11 = vpop.permute.xlu1 %481  ;;  %v568_v12 = vpop.permute.xlu2 %567 }
  0xc8   : > { %519 = vmatpush.bf16.msrb.mxu0 %v505_v9  ;;  %532 = vmatpush.bf16.msrb.mxu1 %v508_v10  ;;  %v587_v13 = vsel %vm224_vm0, %v568_v12, 0  ;;  %v494_v14 = vsel %vm493_vm5, %v482_v11, %v484_v53 }
  0xcc   : > { %520 = vmatpush.bf16.msrb.mxu0 %v494_v14  ;;  %533 = vmatpush.bf16.msrb.mxu1 %v495_v15 }
  0xcd   : > { %v564_v17 = vpop.permute.xlu0 %563  ;;  %v299_v8 = vpop.f32.mrf.mxu3 }
  0xcf   : > { %986 = vmatmul.msk.bf16.vlgmr.msrb.gmra.mxu2 %vm220_vm1, %v983_v16  ;;  %v566_v18 = vpop.permute.xlu1 %565  ;;  %v718_v32 = vpop.permute.xlu2 %717 }
  0xd0   : > { %621 = vmatpush.bf16.msra.mxu1 %v587_v13  ;;  %v572_v19 = vsel %vm569_vm6, %v564_v17, %v566_v18  ;;  %v573_v20 = vsel %vm569_vm6, %v566_v18, %v568_v12 }
  0xd1   : > { %v581_v21 = vsel %vm224_vm0, %v572_v19, 0  ;;  %v584_v22 = vsel %vm224_vm0, %v573_v20, 0  ;;  %984 = vmatmul.msk.bf16.vlgmr.msrb.gmra.mxu0 %vm220_vm1, %v983_v16  ;;  %985 = vmatmul.msk.bf16.vlgmr.msrb.gmra.mxu1 %vm220_vm1, %v983_v16 }
  0xd2   : > { %595 = vmatpush.bf16.msrb.mxu3 %v581_v21  ;;  %608 = vmatpush.bf16.msra.mxu0 %v584_v22 }
  0xd5   : > { %v642_v23 = vpop.permute.xlu0 %641 }
  0xd6   : > { %v648_v24 = vsel %vm645_vm7, %v640_v60, %v642_v23 }
  0xd7   : > { %v657_v25 = vsel %vm224_vm0, %v648_v24, 0  ;;  %v558_v26 = vpop.permute.xlu1 %557  ;;  %v712_v40 = vpop.permute.xlu2 %711 }
  0xd8   : > { %v570_v27 = vsel %vm569_vm6, %v558_v26, %v560_v5  ;;  %671 = vmatpush.bf16.msra.mxu2 %v657_v25 }
  0xd9   : > { %596 = vmatpush.bf16.msrb.mxu3 %v570_v27 }
  0xdc   : > { %988 = vmatmul.msk.bf16.vlgmr.msrb.gmra.mxu3 %vm220_vm1, %v987_v28 }
  0xdd   : > { %v634_v29 = vpop.permute.xlu0 %633 }
  0xdf   : > { %v636_v30 = vpop.permute.xlu1 %635  ;;  %v710_v49 = vpop.permute.xlu2 %709 }
  0xe0   : > { %v646_v31 = vsel %vm645_vm7, %v634_v29, %v636_v30  ;;  %v722_v57 = vsel %vm721_vm8, %v710_v49, %v712_v40 }
  0xe1   : > { %672 = vmatpush.bf16.msra.mxu2 %v646_v31 }
  0xe4   : > { %992 = vmatmul.msk.bf16.vlgmr.msra.gmra.mxu2 %vm220_vm1, %v991_v33 }
  0xe5   : > { %v562_v34 = vpop.permute.xlu0 %561 }
  0xe6   : > { %622 = vmatpush.bf16.msra.mxu1 %v562_v34  ;;  %v571_v35 = vsel %vm569_vm6, %v560_v5, %v562_v34  ;;  %v999_v5 = vld [vmem:[%s1431_s1 + $0x20] sm:$0xf] }
  0xe7   : > { %v644_v36 = vpop.permute.xlu1 %643  ;;  %609 = vmatpush.bf16.msra.mxu0 %v571_v35  ;;  %v792_v59 = vpop.permute.xlu2 %791 }
  0xe8   : > { %v649_v37 = vsel %vm645_vm7, %v642_v23, %v644_v36  ;;  %v663_v38 = vsel %vm224_vm0, %v644_v36, 0 }
  0xe9   : > { %v660_v39 = vsel %vm224_vm0, %v649_v37, 0  ;;  %990 = vmatmul.msk.bf16.vlgmr.msra.gmra.mxu1 %vm220_vm1, %v987_v28 }
  0xea   : > { %989 = vmatmul.msk.bf16.vlgmr.msra.gmra.mxu0 %vm220_vm1, %v987_v28  ;;  %684 = vmatpush.bf16.msra.mxu3 %v660_v39 }
  0xeb   : > { %697 = vmatpush.bf16.msrb.mxu0 %v663_v38 }
  0xed   : > { %v720_v41 = vpop.permute.xlu0 %719 }
  0xee   : > { %v725_v42 = vsel %vm721_vm8, %v718_v32, %v720_v41  ;;  %v739_v46 = vsel %vm224_vm0, %v720_v41, 0 }
  0xef   : > { %v736_v43 = vsel %vm224_vm0, %v725_v42, 0  ;;  %v638_v44 = vpop.permute.xlu1 %637  ;;  %v788_v4 = vpop.permute.xlu2 %787 }
  0xf0   : > { %698 = vmatpush.bf16.msrb.mxu0 %v638_v44  ;;  %v647_v45 = vsel %vm645_vm7, %v636_v30, %v638_v44  ;;  %760 = vmatpush.bf16.msrb.mxu2 %v736_v43 }
  0xf1   : > { %685 = vmatpush.bf16.msra.mxu3 %v647_v45 }
  0xf4   : > { %993 = vmatmul.msk.bf16.vlgmr.msra.gmra.mxu3 %vm220_vm1, %v991_v33 }
  0xf5   : > { %773 = vmatpush.bf16.msrb.mxu3 %v739_v46  ;;  %v714_v50 = vpop.permute.xlu0 %713 }
  0xf6   : > { %v723_v51 = vsel %vm721_vm8, %v712_v40, %v714_v50 }
  0xf7   : > { %v716_v52 = vpop.permute.xlu1 %715  ;;  %761 = vmatpush.bf16.msrb.mxu2 %v723_v51 }
  0xf8   : > { %v724_v53 = vsel %vm721_vm8, %v716_v52, %v718_v32 }
  0xf9   : > { %774 = vmatpush.bf16.msrb.mxu3 %v714_v50  ;;  %v733_v55 = vsel %vm224_vm0, %v724_v53, 0 }
  0xfa   : > { %994 = vmatmul.msk.bf16.vlgmr.msrb.gmra.mxu0 %vm220_vm1, %v991_v33  ;;  %747 = vmatpush.bf16.msrb.mxu1 %v733_v55 }
  0xfb   : > { %997 = vmatmul.msk.bf16.vlgmr.msrb.gmra.mxu2 %vm220_vm1, %v995_v54 }
  0xfd   : > { %v796_v56 = vpop.permute.xlu0 %795 }
  0xfe   : > { %v815_v58 = vsel %vm224_vm0, %v796_v56, 0  ;;  %748 = vmatpush.bf16.msrb.mxu1 %v722_v57 }
  0xff   : > { %849 = vmatpush.bf16.msra.mxu2 %v815_v58  ;;  %v790_v60 = vpop.permute.xlu1 %789 }
 0x100   : > { %v799_v7 = vsel %vm797_vm9, %v788_v4, %v790_v60 }
 0x101   : > { %996 = vmatmul.msk.bf16.vlgmr.msrb.gmra.mxu1 %vm220_vm1, %v995_v54 }
 0x103   : > { %850 = vmatpush.bf16.msra.mxu2 %v790_v60 }
 0x104   : > { %998 = vmatmul.msk.bf16.vlgmr.msrb.gmra.mxu3 %vm220_vm1, %v995_v54 }
 0x105   : > { %v794_v61 = vpop.permute.xlu0 %793 }
 0x106   : > { %v800_v62 = vsel %vm797_vm9, %v792_v59, %v794_v61  ;;  %v801_v63 = vsel %vm797_vm9, %v794_v61, %v796_v56 }
 0x107   : > { %v809_v1 = vsel %vm224_vm0, %v800_v62, 0  ;;  %v812_v2 = vsel %vm224_vm0, %v801_v63, 0  ;;  %v786_v3 = vpop.permute.xlu1 %785 }
 0x108   : > { %823 = vmatpush.bf16.msra.mxu0 %v809_v1  ;;  %836 = vmatpush.bf16.msra.mxu1 %v812_v2  ;;  %v798_v6 = vsel %vm797_vm9, %v786_v3, %v788_v4 }
 0x10b   : > { %1002 = vmatmul.msk.bf16.vlgmr.msra.gmra.mxu2 %vm220_vm1, %v999_v5 }
 0x10c   : > { %824 = vmatpush.bf16.msra.mxu0 %v798_v6  ;;  %837 = vmatpush.bf16.msra.mxu1 %v799_v7 }
 0x10f   : > { %1000 = vmatmul.msk.bf16.vlgmr.msra.gmra.mxu0 %vm220_vm1, %v999_v5 }
 0x111   : > { %1001 = vmatmul.msk.bf16.vlgmr.msra.gmra.mxu1 %vm220_vm1, %v999_v5 }
 0x11e   : > { %v243_v9 = vpop.f32.mrf.mxu0  ;;  %v256_v10 = vpop.f32.mrf.mxu1 }
 0x11f   : > { %v298_v11 = vadd.f32 %v297_v0, %v243_v9 }
 0x122   : > { %v269_v12 = vpop.f32.mrf.mxu2 }
 0x126   : > { %v245_v13 = vpop.f32.mrf.mxu0  ;;  %v258_v14 = vpop.f32.mrf.mxu1 }
 0x12a   : > { %v271_v15 = vpop.f32.mrf.mxu2 }
 0x12e   : > { %v310_v16 = vpop.f32.mrf.mxu0  ;;  %v323_v17 = vpop.f32.mrf.mxu1 }
 0x12f   : > { %v311_v18 = vadd.f32 %v310_v16, %v256_v10  ;;  %v324_v19 = vadd.f32 %v323_v17, %v269_v12  ;;  %v863_v10 = vpop.permute.xlu0 %862 }
 0x132   : > { %v370_v20 = vpop.f32.mrf.mxu2 }
 0x133   : > { %v400_v21 = vadd.f32 %v370_v20, %v298_v11 }
 0x136   : > { %v312_v22 = vpop.f32.mrf.mxu0  ;;  %v325_v23 = vpop.f32.mrf.mxu1 }
 0x138   : > { %v383_v24 = vpop.f32.mrf.mxu3 }
 0x139   : > { %v401_v25 = vadd.f32 %v383_v24, %v311_v18 }
 0x13a   : > { %v372_v26 = vpop.f32.mrf.mxu2 }
 0x13e   : > { %v396_v27 = vpop.f32.mrf.mxu0  ;;  %v446_v28 = vpop.f32.mrf.mxu1 }
 0x13f   : > { %v402_v29 = vadd.f32 %v396_v27, %v324_v19  ;;  %v476_v30 = vadd.f32 %v446_v28, %v400_v21 }
 0x140   : > { %v385_v31 = vpop.f32.mrf.mxu3 }
 0x142   : > { %v459_v32 = vpop.f32.mrf.mxu2 }
 0x143   : > { %v477_v33 = vadd.f32 %v459_v32, %v401_v25 }
 0x146   : > { %v398_v34 = vpop.f32.mrf.mxu0  ;;  %v448_v35 = vpop.f32.mrf.mxu1 }
 0x148   : > { %v472_v36 = vpop.f32.mrf.mxu3 }
 0x149   : > { %v478_v59 = vadd.f32 %v472_v36, %v402_v29 }
 0x14a   : > { %v461_v37 = vpop.f32.mrf.mxu2 }
 0x14e   : > { %v522_v38 = vpop.f32.mrf.mxu0  ;;  %v535_v39 = vpop.f32.mrf.mxu1 }
 0x14f   : > { %v552_v60 = vadd.f32 %v522_v38, %v476_v30  ;;  %v553_v63 = vadd.f32 %v535_v39, %v477_v33 }
 0x150   : > { %v474_v40 = vpop.f32.mrf.mxu3 }
 0x152   : > { %v548_v41 = vpop.f32.mrf.mxu2 }
 0x153   : > { %v554_v0 = vadd.f32 %v548_v41, %v478_v59 }
 0x156   : > { %v537_v42 = vpop.f32.mrf.mxu1  ;;  %v524_v43 = vpop.f32.mrf.mxu0 }
 0x15a   : > { %v550_v44 = vpop.f32.mrf.mxu2 }
 0x15f   : > { %v598_v45 = vpop.f32.mrf.mxu3 }
 0x160   : > { %v628_v1 = vadd.f32 %v598_v45, %v552_v60 }
 0x166   : > { %v624_v46 = vpop.f32.mrf.mxu1 }
 0x167   : > { %v611_v47 = vpop.f32.mrf.mxu0  ;;  %v674_v48 = vpop.f32.mrf.mxu2  ;;  %v630_v3 = vadd.f32 %v624_v46, %v554_v0 }
 0x168   : > { %v600_v49 = vpop.f32.mrf.mxu3  ;;  %v629_v4 = vadd.f32 %v611_v47, %v553_v63  ;;  %v704_v5 = vadd.f32 %v674_v48, %v628_v1 }
 0x16e   : > { %v626_v50 = vpop.f32.mrf.mxu1 }
 0x16f   : > { %v613_v51 = vpop.f32.mrf.mxu0  ;;  %v676_v52 = vpop.f32.mrf.mxu2 }
 0x177   : > { %v687_v53 = vpop.f32.mrf.mxu3  ;;  %v700_v54 = vpop.f32.mrf.mxu0 }
 0x178   : > { %v705_v6 = vadd.f32 %v687_v53, %v629_v4  ;;  %v706_v7 = vadd.f32 %v700_v54, %v630_v3 }
 0x17e   : > { %v763_v55 = vpop.f32.mrf.mxu2  ;;  %v750_v56 = vpop.f32.mrf.mxu1 }
 0x17f   : > { %v689_v57 = vpop.f32.mrf.mxu3  ;;  %v702_v58 = vpop.f32.mrf.mxu0  ;;  %v780_v8 = vadd.f32 %v750_v56, %v704_v5  ;;  %v781_v11 = vadd.f32 %v763_v55, %v705_v6 }
 0x186   : > { %v765_v61 = vpop.f32.mrf.mxu2  ;;  %v752_v62 = vpop.f32.mrf.mxu1 }
 0x187   : > { %v776_v2 = vpop.f32.mrf.mxu3 }
 0x188   : > { %v782_v12 = vadd.f32 %v776_v2, %v706_v7 }
 0x18c   : > { %v826_v9 = vpop.f32.mrf.mxu0 }
 0x18d   : > { %v856_v13 = vadd.f32 %v826_v9, %v780_v8 }
 0x18e   : > { %v852_v14 = vpop.f32.mrf.mxu2  ;;  %v839_v15 = vpop.f32.mrf.mxu1 }
 0x18f   : > { %v858_v16 = vadd.f32 %v852_v14, %v782_v12  ;;  %v865_v17 = vadd.f32 %v863_v10, %v856_v13  ;;  %v857_v18 = vadd.f32 %v839_v15, %v781_v11  ;;  %v778_v19 = vpop.f32.mrf.mxu3 }
 0x191   : > { %v867_v20 = vadd.f32 %v863_v10, %v858_v16  ;;  %v868_v21 = vmax.f32 %v865_v17, 0.0  ;;  %v866_v22 = vadd.f32 %v863_v10, %v857_v18 }
 0x193   : > { %v870_v23 = vmax.f32 %v867_v20, 0.0  ;;  %871 = vst [vmem:[%s163_s16] sm:$0xff] %v868_v21  ;;  %v869_v24 = vmax.f32 %v866_v22, 0.0 }
 0x194   : > { %v828_v25 = vpop.f32.mrf.mxu0 }
 0x195   : > { %874 = vst.msk [vmem:[%s163_s16 + $0x10] sm:$0xff] %vm873_vm10, %v870_v23 }
 0x196   : > { %872 = vst [vmem:[%s163_s16 + $0x8] sm:$0xff] %v869_v24  ;;  %v841_v26 = vpop.f32.mrf.mxu1  ;;  %v854_v27 = vpop.f32.mrf.mxu2 }
 0x197   : > { %1088 = shalt.err (!%p1085_p3)
}
 0x198   : > { %1012 = dma.vmem_to_hbm [thread:$0]  (%p1192_p5), %s890_s27, 384, %s892_s28, %s876_s29  }
 0x199 PF: > { %p1018_p4 = scmp.ge.s32.totalorder %s1123_s15, 2  ;;  %s903_s10 = sand.u32 1, %s1111_s12  }
 0x19a   : > { %s904_s11 = scalar_lea.sflag [#allocation3], %s903_s10 }
 0x19b   : > { %p1015_p7 = pnand %p1018_p4, %p1196_p6 }
 0x19d   : > { %p1016_p8 = pneg %p1015_p7 }
 0x19f   : > { %1106 = dma.done.wait (%p1016_p8), %s904_s11, 384  }
 0x1a0   : > { %1108 = vsyncadd (%p1016_p8), %s904_s11, 4294966912  ;;  %p13_p9 = scmp.ge.s32.totalorder %s1179_s18, 4   ;;  %s1436_s12 = smov %s1115_s13 }
 0x1a1   : > { %s1437_s13 = smov %s1119_s14  ;;  %s1438_s14 = smov %s1190_s21 }
 0x1a2   : > { %s1439_s15 = smov %s1179_s18  ;;  %15 = sbr.rel (!%p13_p9) target bundleno = 3 (0x3), region = 75 }
 0x1a7   :  { %910 = vsyncpa [#allocation3], 1 }
 0x1a8   :  { %912 = vsyncpa [#allocation3 + $0x1], 1 }

</bundles_post_ra>
